<compile_context>
chip_gen: v5e
topology: v5e:2x2
jax: 0.10.0
libtpu: 0.0.40
codegen_flags: <defaults>
</compile_context>

<pallas_src>
import functools

import numpy as np
import jax
import jax.numpy as jnp
from jax.experimental import pallas as pl
from jax.experimental.pallas import tpu as pltpu

BASIC_DIMS = 8
NUM_CLS = 4
LRELU_SLOPE = 0.2
IN_EPS = 1e-5


def _round_up(n, m):
    return (n + m - 1) // m * m


# ----------------------------------------------------------------------------
# Probe: resolve pltpu.roll rotation direction (run once, eagerly, at import)
# ----------------------------------------------------------------------------
def _probe_roll_is_jnp_like():
    x = jnp.arange(8 * 256, dtype=jnp.float32).reshape(8, 256)

    def k(x_ref, o_ref):
        o_ref[...] = pltpu.roll(x_ref[...], 3, 1)

    out = pl.pallas_call(
        k, out_shape=jax.ShapeDtypeStruct((8, 256), jnp.float32))(x)
    out = np.asarray(jax.block_until_ready(out))
    return bool(np.allclose(out, np.asarray(jnp.roll(x, 3, axis=1))))


_ROLL_IS_JNP_LIKE = _probe_roll_is_jnp_like()


# ----------------------------------------------------------------------------
# Pallas kernels
# ----------------------------------------------------------------------------
def _in_lrelu(a, mask, inv_n):
    """Non-affine InstanceNorm (masked stats over valid lanes) + LeakyReLU."""
    am = a * mask
    mean = jnp.sum(am, axis=1, keepdims=True) * inv_n            # (C, 1)
    d = (a - mean) * mask
    var = jnp.sum(d * d, axis=1, keepdims=True) * inv_n
    y = (a - mean) * jax.lax.rsqrt(var + IN_EPS)
    return jnp.where(y >= 0.0, y, LRELU_SLOPE * y)


def _stage_kernel(*refs, shifts, cout1, inv_n, has_out, has_seg):
    """Fused decoder stage for one batch element.

    refs (in order):
      x_ref  (1, Cin, L)  bf16   reflect-padded, flattened, 128-padded volume
      m_ref  (1, L)       f32    1.0 at valid (interior) positions
      w3_ref (27*Cout1, Cin) bf16  stacked 3x3x3 weights, tap-major
      [w1_ref (Cout2, Cout1) f32]  fused 1x1x1 "out" conv
      [ws_ref (ncls, Cout2) f32, bs_ref (ncls, 1) f32]  fused seg head
      o_ref  (1, CoutF, L) bf16
      [os_ref (1, ncls, L) f32]
    """
    if has_seg:
        x_ref, m_ref, w3_ref, w1_ref, ws_ref, bs_ref, o_ref, os_ref = refs
    elif has_out:
        x_ref, m_ref, w3_ref, w1_ref, o_ref = refs
    else:
        x_ref, m_ref, w3_ref, o_ref = refs

    x = x_ref[0]                                   # (Cin, L) bf16
    mask = m_ref[...]                              # (1, L)   f32

    # All 27 taps' channel contractions in one bf16 MXU matmul.
    p = jnp.dot(w3_ref[...], x, preferred_element_type=jnp.float32)  # (27*Cout1, L)

    # Combine taps with lane rolls on the (Cout1, L) planes (XLU, cheap).
    acc = None
    for t, s in enumerate(shifts):
        blk = p[t * cout1:(t + 1) * cout1, :]
        if s != 0:
            blk = pltpu.roll(blk, s, 1)
        acc = blk if acc is None else acc + blk

    y = _in_lrelu(acc, mask, inv_n)                # 3x3x3 conv -> IN -> LReLU
    if has_out:                                    # fused 1x1x1 conv -> IN -> LReLU
        z = jnp.dot(w1_ref[...], y, preferred_element_type=jnp.float32)
        y = _in_lrelu(z, mask, inv_n)
    o_ref[0] = y.astype(o_ref.dtype)

    if has_seg:                                    # fused 1x1x1 seg conv + bias
        logits = jnp.dot(ws_ref[...], y, preferred_element_type=jnp.float32)
        logits = logits + bs_ref[...]
        os_ref[0] = logits.astype(os_ref.dtype)


# ----------------------------------------------------------------------------
# Glue (reflect pad / flatten / valid extraction stay in XLA, ~1.4x volume)
# ----------------------------------------------------------------------------
@functools.lru_cache(maxsize=None)
def _valid_mask_np(D, H, W):
    Dp, Hp, Wp = D + 2, H + 2, W + 2
    L = _round_up(Dp * Hp * Wp, 128)
    m = np.zeros((Dp, Hp, Wp), np.float32)
    m[1:-1, 1:-1, 1:-1] = 1.0
    mf = np.zeros((1, L), np.float32)
    mf[0, :Dp * Hp * Wp] = m.reshape(-1)
    return mf


def _tap_offsets(H, W):
    """Flat-index offsets of the 27 taps in padded (Dp, Hp, Wp) space."""
    Hp, Wp = H + 2, W + 2
    return [(kd - 1) * Hp * Wp + (kh - 1) * Wp + (kw - 1)
            for kd in range(3) for kh in range(3) for kw in range(3)]


def _pad_flatten(x):
    """(B, C, D, H, W) -> reflect pad, flatten, 128-pad -> (B, C, L) bf16."""
    B, C, D, H, W = x.shape
    xp = jnp.pad(x, ((0, 0), (0, 0), (1, 1), (1, 1), (1, 1)), mode="reflect")
    Vp = (D + 2) * (H + 2) * (W + 2)
    L = _round_up(Vp, 128)
    xf = xp.reshape(B, C, Vp)
    if L > Vp:
        xf = jnp.pad(xf, ((0, 0), (0, 0), (0, L - Vp)))
    return xf.astype(jnp.bfloat16)


def _extract_valid(yf, D, H, W):
    """(B, C, L) padded-flat -> (B, C, D, H, W) valid region."""
    Dp, Hp, Wp = D + 2, H + 2, W + 2
    B, C = yf.shape[0], yf.shape[1]
    y = yf[:, :, :Dp * Hp * Wp].reshape(B, C, Dp, Hp, Wp)
    return y[:, :, 1:-1, 1:-1, 1:-1]


def conv_stage(x, w3, w1=None, wseg=None, bseg=None):
    """Fused general_conv3d stage on NCDHW input.

    3x3x3 reflect conv + IN + LeakyReLU
      [-> fused 1x1x1 conv + IN + LeakyReLU]      (d*_out layers)
      [-> fused 1x1x1 seg conv + bias, 2nd output] (seg_layer)
    Conv biases are omitted for the IN'd convs (exactly cancelled by the
    non-affine InstanceNorm).
    """
    assert wseg is None or w1 is not None
    B, Cin, D, H, W = x.shape
    Cout1 = int(w3.shape[0])
    has_out = w1 is not None
    has_seg = wseg is not None
    CoutF = int(w1.shape[0]) if has_out else Cout1

    xf = _pad_flatten(x)                            # (B, Cin, L) bf16
    L = xf.shape[-1]
    mask = jnp.asarray(_valid_mask_np(D, H, W))     # (1, L) f32
    offs = _tap_offsets(H, W)
    shifts = tuple(((-o) % L) if _ROLL_IS_JNP_LIKE else (o % L) for o in offs)

    # (Cout, Cin, 3, 3, 3) -> tap-major (27*Cout, Cin), same tap order as offs.
    w3s = jnp.transpose(w3, (2, 3, 4, 0, 1)).reshape(27 * Cout1, Cin)
    w3s = w3s.astype(jnp.bfloat16)
    inv_n = 1.0 / float(D * H * W)

    in_specs = [
        pl.BlockSpec((1, Cin, L), lambda b: (b, 0, 0)),
        pl.BlockSpec((1, L), lambda b: (0, 0)),
        pl.BlockSpec((27 * Cout1, Cin), lambda b: (0, 0)),
    ]
    inputs = [xf, mask, w3s]
    if has_out:
        w1m = w1.reshape(CoutF, Cout1).astype(jnp.float32)
        in_specs.append(pl.BlockSpec((CoutF, Cout1), lambda b: (0, 0)))
        inputs.append(w1m)
    if has_seg:
        ncls = int(wseg.shape[0])
        wsm = wseg.reshape(ncls, CoutF).astype(jnp.float32)
        bsm = bseg.reshape(ncls, 1).astype(jnp.float32)
        in_specs += [pl.BlockSpec((ncls, CoutF), lambda b: (0, 0)),
                     pl.BlockSpec((ncls, 1), lambda b: (0, 0))]
        inputs += [wsm, bsm]

    main_shape = jax.ShapeDtypeStruct((B, CoutF, L), jnp.bfloat16)
    main_spec = pl.BlockSpec((1, CoutF, L), lambda b: (b, 0, 0))
    if has_seg:
        out_shape = (main_shape, jax.ShapeDtypeStruct((B, ncls, L), jnp.float32))
        out_specs = (main_spec, pl.BlockSpec((1, ncls, L), lambda b: (b, 0, 0)))
    else:
        out_shape = main_shape
        out_specs = main_spec

    kern = functools.partial(_stage_kernel, shifts=shifts, cout1=Cout1,
                             inv_n=inv_n, has_out=has_out, has_seg=has_seg)
    res = pl.pallas_call(
        kern,
        out_shape=out_shape,
        grid=(B,),
        in_specs=in_specs,
        out_specs=out_specs,
        compiler_params=pltpu.CompilerParams(
            dimension_semantics=("parallel",)),
    )(*inputs)

    if has_seg:
        de, seg = res
        return _extract_valid(de, D, H, W), _extract_valid(seg, D, H, W)
    return _extract_valid(res, D, H, W)


# ----------------------------------------------------------------------------
# Trilinear x2 upsample (align_corners=True) -- left to XLA per review.
# ----------------------------------------------------------------------------
@functools.lru_cache(maxsize=None)
def _interp_matrix_np(n):
    m = 2 * n
    A = np.zeros((m, n), np.float32)
    if n == 1:
        A[:, 0] = 1.0
        return A
    for i in range(m):
        src = i * (n - 1) / (m - 1)
        i0 = min(int(np.floor(src)), n - 1)
        i1 = min(i0 + 1, n - 1)
        f = src - i0
        A[i, i0] += 1.0 - f
        A[i, i1] += f
    return A


def trilinear_up2x(x):
    B, C, D, H, W = x.shape
    Ad = jnp.asarray(_interp_matrix_np(D))
    Ah = jnp.asarray(_interp_matrix_np(H))
    Aw = jnp.asarray(_interp_matrix_np(W))
    y = x.astype(jnp.float32)
    y = jnp.einsum("bcdhw,ed->bcehw", y, Ad)
    y = jnp.einsum("bcehw,fh->bcefw", y, Ah)
    y = jnp.einsum("bcefw,gw->bcefg", y, Aw)
    return y


# ----------------------------------------------------------------------------
# Parameters & forward
# ----------------------------------------------------------------------------
def init_params(key, bd=BASIC_DIMS, num_cls=NUM_CLS):
    specs = {
        "d3_c1": (bd * 4, bd * 8, 3), "d3_c2": (bd * 4, bd * 8, 3),
        "d3_out": (bd * 4, bd * 4, 1),
        "d2_c1": (bd * 2, bd * 4, 3), "d2_c2": (bd * 2, bd * 4, 3),
        "d2_out": (bd * 2, bd * 2, 1),
        "d1_c1": (bd, bd * 2, 3), "d1_c2": (bd, bd * 2, 3),
        "d1_out": (bd, bd, 1),
        "seg_w": (num_cls, bd, 1),
    }
    keys = jax.random.split(key, len(specs) + 1)
    params = {}
    for (name, (co, ci, ks)), k in zip(specs.items(), keys[:-1]):
        fan_in = ci * ks ** 3
        params[name] = (jax.random.normal(k, (co, ci, ks, ks, ks), jnp.float32)
                        / np.sqrt(fan_in))
    params["seg_b"] = 0.1 * jax.random.normal(keys[-1], (num_cls,), jnp.float32)
    # Biases of the general_conv3d convs are omitted: the non-affine
    # InstanceNorm3d that follows cancels them exactly (review feedback).
    return params


def decoder_fuse_forward(x1, x2, x3, x4, mask, params):
    """Decoder_fuse forward.  Inputs NCDHW; returns (seg logits, de_x1..de_x4).

    TODO(synk): prm_generator_* and region_aware_modal_fusion are not defined
    in the provided source; the RFM blocks are treated as identity on the skip
    features and the prm predictions are not produced.  `mask` is accepted for
    signature parity but unused.
    """
    del mask
    p = params

    de_x4 = conv_stage(trilinear_up2x(x4), p["d3_c1"])
    cat3 = jnp.concatenate([x3.astype(jnp.bfloat16), de_x4], axis=1)
    de_x3 = conv_stage(cat3, p["d3_c2"], w1=p["d3_out"])

    de_x3u = conv_stage(trilinear_up2x(de_x3), p["d2_c1"])
    cat2 = jnp.concatenate([x2.astype(jnp.bfloat16), de_x3u], axis=1)
    de_x2 = conv_stage(cat2, p["d2_c2"], w1=p["d2_out"])

    de_x2u = conv_stage(trilinear_up2x(de_x2), p["d1_c1"])
    cat1 = jnp.concatenate([x1.astype(jnp.bfloat16), de_x2u], axis=1)
    de_x1, pred = conv_stage(cat1, p["d1_c2"], w1=p["d1_out"],
                             wseg=p["seg_w"], bseg=p["seg_b"])

    feats = tuple(t.astype(jnp.float32) for t in (de_x1, de_x2u, de_x3u, de_x4))
    return pred, feats


# ----------------------------------------------------------------------------
# Pure-XLA reference for one stage (numerical sanity check of the kernel math)
# ----------------------------------------------------------------------------
def _reference_stage(x, w3):
    xp = jnp.pad(x, ((0, 0), (0, 0), (1, 1), (1, 1), (1, 1)), mode="reflect")
    y = jax.lax.conv_general_dilated(
        xp, w3, window_strides=(1, 1, 1), padding="VALID",
        dimension_numbers=("NCDHW", "OIDHW", "NCDHW"))
    mean = jnp.mean(y, axis=(2, 3, 4), keepdims=True)
    var = jnp.mean(jnp.square(y - mean), axis=(2, 3, 4), keepdims=True)
    y = (y - mean) * jax.lax.rsqrt(var + IN_EPS)
    return jnp.where(y >= 0.0, y, LRELU_SLOPE * y)


# ----------------------------------------------------------------------------
if __name__ == "__main__":
    B, bd = 2, BASIC_DIMS
    k1, k2, k3, k4, kc = jax.random.split(jax.random.PRNGKey(0), 5)
    x1 = jax.random.normal(k1, (B, bd, 16, 16, 16), jnp.float32)
    x2 = jax.random.normal(k2, (B, bd * 2, 8, 8, 8), jnp.float32)
    x3 = jax.random.normal(k3, (B, bd * 4, 4, 4, 4), jnp.float32)
    x4 = jax.random.normal(k4, (B, bd * 8, 2, 2, 2), jnp.float32)
    modal_mask = jnp.ones((B, NUM_CLS), dtype=bool)   # unused (see TODO above)

    params = init_params(jax.random.PRNGKey(1))

    # Single-stage sanity check of the fused conv kernel vs an XLA reference
    # (bf16 storage => loose absolute tolerance on O(1) normalized outputs).
    xc = jax.random.normal(kc, (B, bd * 4, 8, 8, 8), jnp.float32)
    got = np.asarray(conv_stage(xc, params["d2_c1"]).astype(jnp.float32))
    ref = np.asarray(_reference_stage(xc, params["d2_c1"]))
    assert got.shape == ref.shape, (got.shape, ref.shape)
    assert np.max(np.abs(got - ref)) < 0.15, float(np.max(np.abs(got - ref)))

    fwd = jax.jit(decoder_fuse_forward)
    pred, feats = fwd(x1, x2, x3, x4, modal_mask, params)
    pred, feats = jax.block_until_ready((pred, feats))

    assert pred.shape == (B, NUM_CLS, 16, 16, 16), pred.shape
    assert feats[0].shape == (B, bd, 16, 16, 16), feats[0].shape
    assert bool(jnp.all(jnp.isfinite(pred)))
    assert all(bool(jnp.all(jnp.isfinite(f))) for f in feats)
    print("KERNEL_OK")
</pallas_src>

<mosaic_0001>
module attributes {stable_mosaic.version = 11 : i64} {
  func.func @k(%arg0: memref<8x256xf32, #tpu.memory_space<vmem>>, %arg1: memref<8x256xf32, #tpu.memory_space<vmem>>) attributes {dimension_semantics = [], scalar_prefetch = 0 : i64, scratch_operands = 0 : i64, tpu.core_type = #tpu.core_type<tc>} {
    %c0 = arith.constant 0 : index
    %c0_0 = arith.constant 0 : index
    %0 = vector.load %arg0[%c0, %c0_0] : memref<8x256xf32, #tpu.memory_space<vmem>>, vector<8x256xf32>
    %c3_i32 = arith.constant 3 : i32
    %1 = tpu.dynamic_rotate %0 by %c3_i32 dim 1 : vector<8x256xf32>, i32 -> vector<8x256xf32>
    %c0_1 = arith.constant 0 : index
    %c0_2 = arith.constant 0 : index
    %2 = vector.load %arg1[%c0_1, %c0_2] : memref<8x256xf32, #tpu.memory_space<vmem>>, vector<8x256xf32>
    tpu.vector_store %arg1[%c0_1, %c0_2], %1 {strides = array<i32>} : memref<8x256xf32, #tpu.memory_space<vmem>>, vector<8x256xf32>,
    return
  }
}

</mosaic_0001>

<bundles_post_ra>
// kernel: tpu_custom_call.1
= control target key start
LH: loop header
LB: loop body
LE: loop exit
PB: predicated region body
PF: predicated region fallthrough
CT: control target
= control target key end

     0   :  { %6 = vsyncpa [#allocation3], 0  ;;  %s127_s0 = inlined_call_operand.hbm [shape: f32[8,256], index: 0, kind: input, shape index: {}]   ;;  %s128_s1 = inlined_call_operand.hbm [shape: f32[8,256], index: 1, kind: output, shape index: {}]  }
   0x1   :  { %7 = vsyncpa [#allocation4], 0  ;;  %s13_s8 = sshll.u32 %s127_s0, 4  ;;  %s108_s9 = smov [#allocation2]   ;;  %s14_s8 = int_to_ptr.hbm [resolvable:$true] %s13_s8 }
   0x2   :  { %s15_s10 = sshll.u32 %s108_s9, 4  ;;  %s16_s10 = int_to_ptr.vmem [resolvable:$true] %s15_s10 }
   0x3   :  { %18 = dma.hbm_to_vmem [thread:$0]  %s14_s8, 256, %s16_s10, [#allocation3]  }
   0x4   :  { %104 = dma.done.wait [#allocation3], 256  }
   0x5   :  { %105 = vsyncadd [#allocation3], 4294967040  ;;  %v23_v0 = vld [vmem:[#allocation2] sm:$0xff]  ;;  %s109_s11 = smov 3   ;;  %v24_v1 = vld [vmem:[#allocation2 + $0x8] sm:$0xff]  ;;  %v29_v2 = vlaneseq  ;;  %s110_s12 = smov [#allocation5]  }
   0x6   :  { %25 = vrot.lane.b32.xlu0 %v23_v0, %s109_s11  ;;  %s41_s13 = sshll.u32 %s110_s12, 4  ;;  %s43_s15 = sshll.u32 %s128_s1, 4  ;;  %s42_s13 = int_to_ptr.vmem [resolvable:$true] %s41_s13  ;;  %s44_s15 = int_to_ptr.hbm [resolvable:$true] %s43_s15 }
   0x7   :  { %v30_v4 = vand.u32 127, %v29_v2 }
   0x9   :  { %vm31_vm0 = vcmp.lt.s32.totalorder %v30_v4, 3 }
   0xe   :  { %27 = vrot.lane.b32.xlu0 %v24_v1, %s109_s11 }
  0x78   :  { %v26_v3 = vpop.permute.xlu0 %25 }
  0x80   :  { %v28_v5 = vpop.permute.xlu0 %27 }
  0x81   :  { %v32_v6 = vsel %vm31_vm0, %v26_v3, %v28_v5  ;;  %v33_v7 = vsel %vm31_vm0, %v28_v5, %v26_v3 }
  0x82   :  { %34 = vst [vmem:[#allocation5] sm:$0xff] %v33_v7 }
  0x83   :  { %35 = vst [vmem:[#allocation5 + $0x8] sm:$0xff] %v32_v6 }
  0x84   :  { %46 = dma.vmem_to_hbm [thread:$0]  %s42_s13, 256, %s44_s15, [#allocation4]  }
  0x85   :  { %106 = dma.done.wait [#allocation4], 256  }
  0x86   :  { %107 = vsyncadd [#allocation4], 4294967040 }
  0x87   :  { %51 = vsyncpa [#allocation3], 1 }
  0x88   :  { %52 = vsyncpa [#allocation4], 1 }

</bundles_post_ra>
